<compile_context>
chip_gen: v7x
topology: tpu7x:2x2x1
jax: 0.10.0
libtpu: 0.0.40
codegen_flags: <defaults>
</compile_context>

<pallas_src>
import functools

import jax
import jax.numpy as jnp
from jax.experimental import pallas as pl
from jax.experimental.pallas import tpu as pltpu


def _round_up(n: int, m: int) -> int:
    return ((n + m - 1) // m) * m


# VMEM policy: budget the tile so everything fits on v7x (64 MiB physical,
# smallest of all generations) with headroom for compiler scratch/spills, and
# raise the scoped limit above the v5e (16 MiB) / v6e (32 MiB) defaults.
_VMEM_LIMIT_BYTES = 48 * 1024 * 1024
_VMEM_BUDGET_BYTES = 40 * 1024 * 1024
_MAX_TILE_B = 1024   # >=512-row tiles already reach ~85% of HBM roofline.


def _pick_tile_b(batch_size, feat_dim, num_classes, x_bytes, c_bytes):
    """Largest batch tile (multiple of 8) that fits the VMEM budget."""
    resident = num_classes * feat_dim * c_bytes            # centers, single copy
    budget = max(_VMEM_BUDGET_BYTES - resident, 1 << 20)
    per_row = (
        2 * feat_dim * x_bytes          # x, double-buffered
        + 2 * feat_dim * 4              # diff + sel working set (f32)
        + num_classes * max(c_bytes, 2)  # one-hot tile in centers dtype
        + 4 * 4                         # labels + per-row output (double-buffered)
    )
    tile_b = budget // max(per_row, 1)
    tile_b = int(min(tile_b, _MAX_TILE_B, _round_up(batch_size, 8)))
    return max(8, (tile_b // 8) * 8)


def _center_loss_kernel(x_ref, c_ref, labels_ref, out_ref, *,
                        batch_size: int, tile_b: int):
    i = pl.program_id(0)

    x = x_ref[...]                      # (TB, D), native dtype
    c = c_ref[...]                      # (C, D),  native dtype, VMEM-resident
    labels = labels_ref[...]            # (TB, 1), int32

    num_classes = c.shape[0]

    # one-hot(labels) @ centers -> selected center per row.  MXU with f32
    # accumulation; operands stay in their native (possibly bf16) dtype.
    classes = jax.lax.broadcasted_iota(jnp.int32, (tile_b, num_classes), 1)
    onehot = (labels == classes).astype(c.dtype)                     # (TB, C)
    sel = jnp.dot(onehot, c, preferred_element_type=jnp.float32)     # (TB, D)

    # Per-row squared distance, clamped exactly like the PyTorch reference.
    diff = x.astype(jnp.float32) - sel                               # (TB, D)
    dist = jnp.sum(diff * diff, axis=1, keepdims=True)               # (TB, 1)
    dist = jnp.clip(dist, 1e-12, 1000000000000.0)

    # Zero rows beyond the true batch (padding of the last tile) AFTER the
    # clamp so they contribute exactly nothing to the wrapper-side sum.
    row_idx = i * tile_b + jax.lax.broadcasted_iota(jnp.int32, (tile_b, 1), 0)
    valid = (row_idx < batch_size).astype(jnp.float32)
    out_ref[...] = dist * valid


def center_loss(x, centers, labels, *, tile_b=None):
    """x: (B, D) float, centers: (C, D) float, labels: (B,) int in [0, C)."""
    batch_size, feat_dim = x.shape
    num_classes, feat_dim2 = centers.shape
    assert feat_dim == feat_dim2

    if tile_b is None:
        tile_b = _pick_tile_b(batch_size, feat_dim, num_classes,
                              jnp.dtype(x.dtype).itemsize,
                              jnp.dtype(centers.dtype).itemsize)
    tile_b = _round_up(tile_b, 8)

    b_pad = _round_up(batch_size, tile_b)
    num_tiles = b_pad // tile_b

    if b_pad != batch_size:
        x = jnp.pad(x, ((0, b_pad - batch_size), (0, 0)))
        labels = jnp.pad(labels, (0, b_pad - batch_size))
    labels_2d = labels.astype(jnp.int32).reshape(b_pad, 1)

    kernel = functools.partial(
        _center_loss_kernel, batch_size=batch_size, tile_b=tile_b)

    per_row = pl.pallas_call(
        kernel,
        out_shape=jax.ShapeDtypeStruct((b_pad, 1), jnp.float32),
        grid_spec=pltpu.PrefetchScalarGridSpec(
            num_scalar_prefetch=0,
            grid=(num_tiles,),
            in_specs=[
                # x / labels: streamed in batch tiles, double-buffered DMA.
                pl.BlockSpec((tile_b, feat_dim), lambda i: (i, 0)),
                # centers: whole array, single VMEM-resident copy.
                pl.BlockSpec(memory_space=pltpu.MemorySpace.VMEM),
                pl.BlockSpec((tile_b, 1), lambda i: (i, 0)),
            ],
            # Disjoint per-tile output blocks -> fully parallel grid.
            out_specs=pl.BlockSpec((tile_b, 1), lambda i: (i, 0)),
        ),
        compiler_params=pltpu.CompilerParams(
            dimension_semantics=("parallel",),   # dual-TC on v7x
            vmem_limit_bytes=_VMEM_LIMIT_BYTES,
        ),
    )(x, labels_2d, centers) if False else pl.pallas_call(
        kernel,
        out_shape=jax.ShapeDtypeStruct((b_pad, 1), jnp.float32),
        grid_spec=pltpu.PrefetchScalarGridSpec(
            num_scalar_prefetch=0,
            grid=(num_tiles,),
            in_specs=[
                pl.BlockSpec((tile_b, feat_dim), lambda i: (i, 0)),       # x
                pl.BlockSpec(memory_space=pltpu.MemorySpace.VMEM),        # centers
                pl.BlockSpec((tile_b, 1), lambda i: (i, 0)),              # labels
            ],
            out_specs=pl.BlockSpec((tile_b, 1), lambda i: (i, 0)),
        ),
        compiler_params=pltpu.CompilerParams(
            dimension_semantics=("parallel",),
            vmem_limit_bytes=_VMEM_LIMIT_BYTES,
        ),
    )(x, centers, labels_2d)

    # Final mean in the wrapper: f32 partials summed in f32, divided by the
    # TRUE batch size (padded rows were masked to exactly 0 in the kernel).
    return jnp.sum(per_row) * jnp.float32(1.0 / batch_size)


if __name__ == "__main__":
    # Shapes consistent with the module defaults: num_classes=10, feat_dim=2.
    num_classes = 10
    feat_dim = 2
    batch = 20          # not a multiple of the tile -> exercises grid + padding mask

    key = jax.random.PRNGKey(0)
    k_x, k_c, k_l = jax.random.split(key, 3)

    x = jax.random.normal(k_x, (batch, feat_dim), dtype=jnp.float32)
    centers = jax.random.normal(k_c, (num_classes, feat_dim), dtype=jnp.float32)
    labels = jax.random.randint(k_l, (batch,), 0, num_classes, dtype=jnp.int32)

    loss = center_loss(x, centers, labels, tile_b=8)   # 3 grid steps, 4 padded rows
    jax.block_until_ready(loss)

    # Pure-JAX reference of the original PyTorch math (expansion + gather + clamp + mean).
    distmat_ref = (
        jnp.sum(x**2, axis=1, keepdims=True)
        + jnp.sum(centers**2, axis=1)[None, :]
        - 2.0 * x @ centers.T
    )
    picked_ref = jnp.clip(distmat_ref[jnp.arange(batch), labels], 1e-12, 1e12)
    ref = jnp.mean(picked_ref)
    assert jnp.allclose(loss, ref, rtol=1e-4, atol=1e-5), (loss, ref)

    # Also check the auto-sized tile path (single grid step).
    loss_auto = center_loss(x, centers, labels)
    jax.block_until_ready(loss_auto)
    assert jnp.allclose(loss_auto, ref, rtol=1e-4, atol=1e-5), (loss_auto, ref)

    print("KERNEL_OK")
</pallas_src>

<mosaic_0001>
module attributes {stable_mosaic.version = 11 : i64} {
  func.func @_center_loss_kernel(%arg0: i32, %arg1: memref<8x2xf32, #tpu.memory_space<vmem>>, %arg2: memref<10x2xf32, #tpu.memory_space<vmem>>, %arg3: memref<8x1xi32, #tpu.memory_space<vmem>>, %arg4: memref<8x1xf32, #tpu.memory_space<vmem>>) attributes {dimension_semantics = [#tpu.dimension_semantics<parallel>], iteration_bounds = array<i64: 3>, scalar_prefetch = 0 : i64, scratch_operands = 0 : i64, tpu.core_type = #tpu.core_type<tc>, window_params = [{transform_indices = @transform_0, window_bounds = array<i64: 8, 2>}, {pipeline_mode = #tpu.pipeline_mode<synchronous>, transform_indices = @transform_1, window_bounds = array<i64: 10, 2>}, {transform_indices = @transform_2, window_bounds = array<i64: 8, 1>}, {transform_indices = @transform_3, window_bounds = array<i64: 8, 1>}]} {
    %c0 = arith.constant 0 : index
    %c0_0 = arith.constant 0 : index
    %0 = vector.load %arg1[%c0, %c0_0] : memref<8x2xf32, #tpu.memory_space<vmem>>, vector<8x2xf32>
    %c0_1 = arith.constant 0 : index
    %c0_2 = arith.constant 0 : index
    %1 = vector.load %arg2[%c0_1, %c0_2] : memref<10x2xf32, #tpu.memory_space<vmem>>, vector<10x2xf32>
    %c0_3 = arith.constant 0 : index
    %c0_4 = arith.constant 0 : index
    %2 = vector.load %arg3[%c0_3, %c0_4] : memref<8x1xi32, #tpu.memory_space<vmem>>, vector<8x1xi32>
    %3 = tpu.iota {dimensions = array<i32: 1>} : vector<8x10xi32>
    %4 = vector.broadcast %2 : vector<8x1xi32> to vector<8x10xi32>
    %5 = arith.cmpi eq, %4, %3 : vector<8x10xi32>
    %6 = arith.extui %5 : vector<8x10xi1> to vector<8x10xi32>
    %7 = arith.sitofp %6 : vector<8x10xi32> to vector<8x10xf32>
    %cst = arith.constant dense<0.000000e+00> : vector<8x2xf32>
    %8 = tpu.matmul %7, %1, %cst {dimension_numbers = #tpu.dot_dimension_numbers<[1], [0], [0], [1], [0, 0, 1, 1], [], []>} : vector<8x10xf32>, vector<10x2xf32>, vector<8x2xf32> -> vector<8x2xf32>
    %9 = arith.subf %0, %8 : vector<8x2xf32>
    %10 = arith.mulf %9, %9 : vector<8x2xf32>
    %cst_5 = arith.constant dense<0.000000e+00> : vector<8xf32>
    %11 = vector.multi_reduction <add>, %10, %cst_5 [1] : vector<8x2xf32> to vector<8xf32>
    %12 = vector.shape_cast %11 : vector<8xf32> to vector<8x1xf32>
    %cst_6 = arith.constant 9.99999996E-13 : f32
    %cst_7 = arith.constant 9.99999995E+11 : f32
    %13 = vector.broadcast %cst_6 : f32 to vector<8x1xf32>
    %14 = arith.maximumf %13, %12 : vector<8x1xf32>
    %15 = vector.broadcast %cst_7 : f32 to vector<8x1xf32>
    %16 = arith.minimumf %15, %14 : vector<8x1xf32>
    %c8_i32 = arith.constant 8 : i32
    %17 = arith.muli %arg0, %c8_i32 : i32
    %18 = tpu.iota {dimensions = array<i32: 0>} : vector<8x1xi32>
    %19 = vector.broadcast %17 : i32 to vector<8x1xi32>
    %20 = arith.addi %19, %18 : vector<8x1xi32>
    %c20_i32 = arith.constant 20 : i32
    %21 = vector.broadcast %c20_i32 : i32 to vector<8x1xi32>
    %22 = arith.cmpi slt, %20, %21 : vector<8x1xi32>
    %23 = arith.extui %22 : vector<8x1xi1> to vector<8x1xi32>
    %24 = arith.sitofp %23 : vector<8x1xi32> to vector<8x1xf32>
    %25 = arith.mulf %16, %24 : vector<8x1xf32>
    %c0_8 = arith.constant 0 : index
    %c0_9 = arith.constant 0 : index
    %26 = vector.load %arg4[%c0_8, %c0_9] : memref<8x1xf32, #tpu.memory_space<vmem>>, vector<8x1xf32>
    tpu.vector_store %arg4[%c0_8, %c0_9], %25 {strides = array<i32>} : memref<8x1xf32, #tpu.memory_space<vmem>>, vector<8x1xf32>,
    return
  }
  func.func @transform_0(%arg0: i32) -> (i32, i32) {
    %c0_i32 = arith.constant 0 : i32
    %c0_i32_0 = arith.constant 0 : i32
    return %arg0, %c0_i32 : i32, i32
  }
  func.func @transform_1(%arg0: i32) -> (i32, i32) {
    %c0_i32 = arith.constant 0 : i32
    %c0_i32_0 = arith.constant 0 : i32
    %c0_i32_1 = arith.constant 0 : i32
    return %c0_i32, %c0_i32_0 : i32, i32
  }
  func.func @transform_2(%arg0: i32) -> (i32, i32) {
    %c0_i32 = arith.constant 0 : i32
    %c0_i32_0 = arith.constant 0 : i32
    return %arg0, %c0_i32 : i32, i32
  }
  func.func @transform_3(%arg0: i32) -> (i32, i32) {
    %c0_i32 = arith.constant 0 : i32
    %c0_i32_0 = arith.constant 0 : i32
    return %arg0, %c0_i32 : i32, i32
  }
}

</mosaic_0001>

<bundles_post_ra>
// kernel: tpu_custom_call.1
= control target key start
LH: loop header
LB: loop body
LE: loop exit
PB: predicated region body
PF: predicated region fallthrough
CT: control target
= control target key end

     0   :  { %s433_s12 = smov 0   ;;  %s469_s0 = inlined_call_operand.vmem [shape: f32[24,2], index: 0, kind: input, shape index: {}]   ;;  %s470_s1 = inlined_call_operand.vmem [shape: f32[10,2], index: 1, kind: input, shape index: {}]   ;;  %s471_s2 = inlined_call_operand.vmem [shape: s32[24,1], index: 2, kind: input, shape index: {}]   ;;  %s472_s3 = inlined_call_operand.vmem [shape: f32[24,1], index: 3, kind: output, shape index: {}]  }
   0x1 LB: > { %s439_s13 = sadd.s32 4294967295, %s406_s12   ;;  %p361_p0 = scmp.ge.s32.totalorder %s406_s12, 1  ;;  %s406_s12 = sphi %s433_s12, %s13_s12  }
   0x2   : > { %p145_p1 = scmp.lt.s32.totalorder %s406_s12, 4 }
   0x4   : > { %p146_p2 = pnand %p361_p0, %p145_p1 }
   0x5   : > { %p171_p3 = scmp.lt.s32.totalorder (!%p146_p2), %s439_s13, 2  ;;  %v184_v0 = vld [vmem:[%s470_s1] sm:$0xff] (!%p146_p2)  ;;  %v185_v1 = vld [vmem:[%s470_s1 + $0x8] sm:$0x3] (!%p146_p2)  ;;  %v408_v2 = vmov (!%p146_p2), 0   ;;  %v409_v3 = vmov (!%p146_p2), 0.0|0.0   ;;  %v187_v7 = vlaneseq (!%p146_p2) }
   0x6   : > { %149 = sbr.rel (%p146_p2) target bundleno = 514 (0x202), region = 32  ;;  %399 = vset.pattern.permute.xlu0 (!%p146_p2), %v408_v2  ;;  %382 = vmatprep.subr.bf16.mxu0 (!%p146_p2), %v409_v3  ;;  %vm199_vm0 = vcmask (!%p146_p2), 1041408   ;;  %v383_v4 = vpack.c.bf16 (!%p146_p2), %v185_v1, %v184_v0  ;;  %vm410_vm1 = vmmov (!%p146_p2), 1   ;;  %vm411_vm3 = vmmov (!%p146_p2), 0   ;;  %s368_s26 = sshll.u32 (!%p146_p2), %s439_s13, 3 }
   0x7   : > { %vm384_vm2 = vmpackc.low (!%p146_p2), %vm199_vm0, %vm410_vm1  ;;  %v412_v6 = vmov (!%p146_p2), 0.0   ;;  %v188_v8 = vand.u32 (!%p146_p2), 127, %v187_v7  ;;  %vm195_vm4 = vcmask (!%p146_p2), 80896   ;;  %vm275_vm6 = vcmask (!%p146_p2), 15360  }
   0x8   : > { %385 = vmatpush3.bf16.msk.msra.mxu0 (!%p146_p2), %vm384_vm2, %v383_v4  ;;  %379 = vmatprep.mubr.msk.f32.mxu0 (!%p146_p2), %vm411_vm3, %v412_v6  ;;  %v283_v17 = vshrl.u32 (!%p146_p2), %v187_v7, 7  ;;  %v284_v18 = vstv (!%p146_p2), %s368_s26  ;;  %vm290_vm8 = vcmask (!%p146_p2), 7168  }
   0xa   : > { %v285_v19 = vadd.s32 (!%p146_p2), %v284_v18, %v283_v17 }
   0xc   : > { %vm286_vm7 = vcmp.lt.s32.totalorder (!%p146_p2), %v285_v19, 20 }
   0xd   : > { %s172_s18 = scalar_select %p171_p3, %s439_s13, 2  ;;  %v369_v22 = vsel %vm286_vm7, 1.0, %v412_v6 }
   0xf   : > { %s451_s19 = sshll.u32 %s172_s18, 3 }
  0x10   : > { %s178_s22 = scalar_lea.vmem %s471_s2, %s451_s19  ;;  %s174_s25 = scalar_lea.vmem %s469_s0, %s451_s19 }
  0x11   : > { %v186_v5 = vld [vmem:[%s178_s22] sm:$0xff]  ;;  %s182_s29 = scalar_lea.vmem %s472_s3, %s451_s19 }
  0x12   : > { %190 = vperm.xlu0 %399, %v186_v5   ;;  %v183_v11 = vld [vmem:[%s174_s25] sm:$0xff] }
  0x91   : > { %v191_v9 = vpop.permute.xlu0 %190 }
  0x92   : > { %vm192_vm5 = vcmp.eq.s32.totalorder %v191_v9, %v188_v8 }
  0x93   : > { %v365_v10 = vsel %vm192_vm5, 1.0, %v412_v6 }
  0x94   : > { %380 = vmatmul.mubr.msk.f32.vlgmr.msra.gmra.mrb[0].mxu0 %vm195_vm4, %v365_v10 }
 0x167   : > { %v269_v12 = vpop.f32.mrb[0].mxu0 }
 0x168   : > { %v273_v13 = vsub.f32 %v183_v11, %v269_v12  ;;  %v381_v14 = vpop.f32.mrb[1].mxu0 }
 0x16a   : > { %v274_v15 = vmul.f32 %v273_v13, %v273_v13 }
 0x16c   : > { %v276_v16 = vsel %vm275_vm6, %v274_v15, 0.0 }
 0x16d   : > { %277 = vadd.xlane.f32.xlu0 %v276_v16 }
 0x1fa   : > { %v278_v20 = vpop.xlane.xlu0 %277 }
 0x1fb   : > { %v279_v21 = vmax.f32 %v278_v20, 1e-12 }
 0x1fd   : > { %v280_v23 = vmin.f32 %v279_v21, 1e+12 }
 0x1ff   : > { %v289_v24 = vmul.f32 %v369_v22, %v280_v23 }
 0x201   : > { %291 = vst.msk [vmem:[%s182_s29] sm:$0xff] %vm290_vm8, %v289_v24 }
 0x202 PF: > { %s13_s12 = sadd.s32 1, %s406_s12  }
 0x203   : > { %p10_p4 = scmp.ge.s32.totalorder %s13_s12, 5  }
 0x205   :  { %12 = sbr.rel (!%p10_p4) target bundleno = 1 (0x1), region = 65 }

</bundles_post_ra>
